<compile_context>
chip_gen: v7x
topology: tpu7x:2x2x1
jax: 0.10.0
libtpu: 0.0.40
codegen_flags: <defaults>
</compile_context>

<pallas_src>
import functools

import jax
import jax.numpy as jnp
from jax.experimental import pallas as pl
from jax.experimental.pallas import tpu as pltpu

_LANES = 128


def _actlog_kernel(x_ref, o_ref, *, eps):
    # Elementwise hot path: clamp to eps (lower bound only), then natural log.
    # Upcast to f32: the op is HBM-bound, so the cast + f32 EUP log are free,
    # and it avoids eps being subnormal in fp16 / rounded in bf16.
    x = x_ref[...].astype(jnp.float32)
    y = jnp.log(jnp.maximum(x, jnp.float32(eps)))
    # NOTE: when the last grid block is ragged (rows % tr != 0) the rows past
    # the slab are uninitialized VMEM; that is safe only because the writeback
    # of the partial block is masked. Do not replace with unmasked wide stores.
    o_ref[...] = y.astype(o_ref.dtype)


def _dtype_sublanes(dtype):
    # Sub-32-bit dtypes pack along sublanes: bf16 vreg is (16,128),
    # int8/fp8 is (32,128). Keep the block sublane dim a multiple of that.
    itemsize = jnp.dtype(dtype).itemsize
    if itemsize >= 4:
        return 8
    if itemsize == 2:
        return 16
    return 32


def _chip_config():
    """Return (block_bytes, vmem_limit_bytes, is_v7) for the attached TPU."""
    kind = ""
    try:
        kind = jax.devices()[0].device_kind.lower()
    except Exception:
        pass
    if "v7" in kind:
        # ~3.2 TB/s HBM: 8 MiB blocks keep the ~0.35us/step pipeline overhead
        # under ~10%. 4 live buffers (in+out, double-buffered) x 8 MiB = 32 MiB
        # exceeds the 32 MiB default scoped limit, so raise it explicitly
        # (64 MiB physical VMEM per TensorCore).
        return 8 * 1024 * 1024, 48 * 1024 * 1024, True
    if "v6" in kind:
        # 4 MiB blocks -> 16 MiB live, under the 32 MiB default scoped limit.
        return 4 * 1024 * 1024, None, False
    # v5e / unknown: 2 MiB blocks -> 8 MiB live, under the 16 MiB default.
    return 2 * 1024 * 1024, None, False


def act_log(x, eps=1e-6, *, min_pallas_bytes=2 * 1024 * 1024,
            block_bytes=None, donate=False):
    """y = log(clamp(x, min=eps)); same shape/dtype as x.

    min_pallas_bytes: below this size (or for non-128-divisible sizes) use a
      fused jnp expression instead of a standalone Pallas kernel.
    block_bytes: override the per-chip VMEM block size (testing / tuning).
    donate: if True (and the caller donates x), alias the input buffer as the
      output on the Pallas path to halve HBM footprint for large activations.
    """
    orig_shape = x.shape
    dtype = x.dtype
    n = x.size
    itemsize = jnp.dtype(dtype).itemsize
    if n == 0:
        return x

    def _jnp_path(v):
        y = jnp.log(jnp.maximum(v.astype(jnp.float32), jnp.float32(eps)))
        return y.astype(dtype)

    # (1) Small inputs: dominated by pallas_call dispatch + DMA fixed cost; the
    #     jnp expression fuses into neighbouring XLA ops instead.
    # (2) Ragged sizes: the fused XLA elementwise op is exactly 2 HBM passes,
    #     strictly better than any pad-the-whole-array Pallas route.
    if n * itemsize < min_pallas_bytes or n % _LANES != 0:
        return _jnp_path(x)

    # --- Lane-dense zero-copy slab ------------------------------------------
    rows = n // _LANES
    slab = x.reshape(rows, _LANES)

    sub = _dtype_sublanes(dtype)
    chip_block_bytes, vmem_limit, is_v7 = _chip_config()
    if block_bytes is None:
        block_bytes = chip_block_bytes

    # Size the tile in *bytes* (constant DMA-pipeline efficiency across dtypes).
    tile_rows = max(sub, block_bytes // (_LANES * itemsize))
    if rows <= sub:
        tr = rows  # block == full array dims (always legal)
    else:
        tr = max(sub, (min(tile_rows, rows) // sub) * sub)
    grid = (pl.cdiv(rows, tr),)  # ragged last block is masked, not shrunk

    # Only CORE_PARALLEL actually shards the streaming axis across v7x's two
    # TensorCores; plain "parallel"/"arbitrary" is a near no-op for codegen.
    if is_v7 and grid[0] >= 2:
        semantics = (pltpu.CORE_PARALLEL,)
    else:
        semantics = ("parallel",)

    cost = pl.CostEstimate(
        flops=n,
        transcendentals=n,
        bytes_accessed=2 * n * itemsize,
    )

    out = pl.pallas_call(
        functools.partial(_actlog_kernel, eps=eps),
        out_shape=jax.ShapeDtypeStruct((rows, _LANES), dtype),
        grid_spec=pltpu.PrefetchScalarGridSpec(
            num_scalar_prefetch=0,
            grid=grid,
            in_specs=[pl.BlockSpec((tr, _LANES), lambda i: (i, 0))],
            out_specs=pl.BlockSpec((tr, _LANES), lambda i: (i, 0)),
        ),
        compiler_params=pltpu.CompilerParams(
            dimension_semantics=semantics,
            vmem_limit_bytes=vmem_limit,
        ),
        cost_estimate=cost,
        input_output_aliases=({0: 0} if donate else {}),
    )(slab)

    return out.reshape(orig_shape)


if __name__ == "__main__":
    key = jax.random.PRNGKey(0)
    k0, k1, k2, k3 = jax.random.split(key, 4)

    def ref(v, eps=1e-6):
        y = jnp.log(jnp.maximum(v.astype(jnp.float32), jnp.float32(eps)))
        return y.astype(v.dtype)

    # 1) Realistic small EEG activation (2*4*16*16 = 2048 elems) -> fused jnp
    #    fallback path (the biggest real-world win per the perf review).
    x = jax.random.normal(k0, (2, 4, 16, 16), dtype=jnp.float32)
    y = jax.block_until_ready(act_log(x, eps=1e-6))
    assert y.shape == x.shape and y.dtype == x.dtype
    assert jnp.allclose(y, ref(x), atol=1e-6, rtol=1e-6)

    # 2) Same tensor forced through the Pallas kernel (size divisible by 128).
    y_k = jax.block_until_ready(act_log(x, eps=1e-6, min_pallas_bytes=0))
    assert jnp.allclose(y_k, ref(x), atol=1e-6, rtol=1e-6)

    # 3) Multi-step grid with a ragged (masked) last block: 240 rows, 128-row
    #    blocks forced via a small block_bytes override.
    x3 = jax.random.normal(k1, (2, 5, 24, 128), dtype=jnp.float32)
    y3 = jax.block_until_ready(
        act_log(x3, eps=1e-6, min_pallas_bytes=0, block_bytes=64 * 1024))
    assert jnp.allclose(y3, ref(x3), atol=1e-6, rtol=1e-6)

    # 4) Single-step multi-row slab through the kernel with chip-default tiles.
    x4 = jax.random.normal(k2, (4, 8, 32, 128), dtype=jnp.float32)
    y4 = jax.block_until_ready(act_log(x4, eps=1e-6, min_pallas_bytes=0))
    assert jnp.allclose(y4, ref(x4), atol=1e-6, rtol=1e-6)

    # 5) bf16 through the kernel: clamp+log computed in f32 internally.
    xb = jax.random.normal(k3, (2, 4, 16, 128), dtype=jnp.bfloat16)
    yb = jax.block_until_ready(act_log(xb, eps=1e-6, min_pallas_bytes=0))
    assert yb.shape == xb.shape and yb.dtype == jnp.bfloat16
    assert jnp.allclose(yb.astype(jnp.float32), ref(xb).astype(jnp.float32),
                        atol=2e-2, rtol=2e-2)

    # 6) Ragged element count -> fused jnp path (zero extra HBM traffic).
    x6 = jax.random.normal(jax.random.PRNGKey(1), (3, 5, 7, 11),
                           dtype=jnp.float32)
    y6 = jax.block_until_ready(act_log(x6, eps=1e-6))
    assert jnp.allclose(y6, ref(x6), atol=1e-6, rtol=1e-6)

    print("KERNEL_OK")
</pallas_src>

<mosaic_0001>
module attributes {stable_mosaic.version = 11 : i64} {
  func.func @_actlog_kernel(%arg0: i32, %arg1: memref<16x128xf32, #tpu.memory_space<vmem>>, %arg2: memref<16x128xf32, #tpu.memory_space<vmem>>) attributes {dimension_semantics = [#tpu.dimension_semantics<parallel>], iteration_bounds = array<i64: 1>, scalar_prefetch = 0 : i64, scratch_operands = 0 : i64, tpu.core_type = #tpu.core_type<tc>, window_params = [{transform_indices = @transform_0, window_bounds = array<i64: 16, 128>}, {transform_indices = @transform_1, window_bounds = array<i64: 16, 128>}]} {
    %c0 = arith.constant 0 : index
    %c0_0 = arith.constant 0 : index
    %0 = vector.load %arg1[%c0, %c0_0] : memref<16x128xf32, #tpu.memory_space<vmem>>, vector<16x128xf32>
    %cst = arith.constant 9.99999997E-7 : f32
    %1 = vector.broadcast %cst : f32 to vector<16x128xf32>
    %2 = arith.maximumf %0, %1 : vector<16x128xf32>
    %3 = math.log %2 : vector<16x128xf32>
    %c0_1 = arith.constant 0 : index
    %c0_2 = arith.constant 0 : index
    %4 = vector.load %arg2[%c0_1, %c0_2] : memref<16x128xf32, #tpu.memory_space<vmem>>, vector<16x128xf32>
    tpu.vector_store %arg2[%c0_1, %c0_2], %3 {strides = array<i32>} : memref<16x128xf32, #tpu.memory_space<vmem>>, vector<16x128xf32>,
    return
  }
  func.func @transform_0(%arg0: i32) -> (i32, i32) {
    %c0_i32 = arith.constant 0 : i32
    %c0_i32_0 = arith.constant 0 : i32
    return %arg0, %c0_i32 : i32, i32
  }
  func.func @transform_1(%arg0: i32) -> (i32, i32) {
    %c0_i32 = arith.constant 0 : i32
    %c0_i32_0 = arith.constant 0 : i32
    return %arg0, %c0_i32 : i32, i32
  }
}

</mosaic_0001>

<bundles_post_ra>
// kernel: tpu_custom_call.1
= control target key start
LH: loop header
LB: loop body
LE: loop exit
PB: predicated region body
PF: predicated region fallthrough
CT: control target
= control target key end

     0   :  { %6 = vsyncpa [#allocation3], 0  ;;  %s150_s0 = inlined_call_operand.hbm [shape: f32[16,128], index: 0, kind: input, shape index: {}]   ;;  %s151_s1 = inlined_call_operand.hbm [shape: f32[16,128], index: 1, kind: output, shape index: {}]  }
   0x1   :  { %7 = vsyncpa [#allocation4], 0  ;;  %s106_s6 = smov [#allocation2]   ;;  %s58_s10 = scalar_lea.hbm %s150_s0, 256 }
   0x2   :  { %s13_s7 = sshll.u32 %s106_s6, 4  ;;  %p59_p0 = scmp.ne.s32.totalorder %s150_s0, %s58_s10  ;;  %s14_s7 = int_to_ptr.vmem [resolvable:$true] %s13_s7 }
   0x3   :  { %p62_p1 = scmp.lt.u32.totalorder %s58_s10, %s150_s0 }
   0x5   :  { %p64_p2 = pnand %p62_p1, %p59_p0 }
   0x7   :  { %67 = shalt.err (!%p64_p2)
}
   0x8   :  { %s68_s15 = scalar_lea.vmem %s14_s7, 256  ;;  %p73_p4 = scmp.lt.s32.totalorder %s14_s7, %s14_s7 }
   0x9   :  { %p69_p3 = scmp.ne.s32.totalorder %s14_s7, %s68_s15  ;;  %p74_p5 = scmp.lt.s32.totalorder %s68_s15, %s68_s15 }
   0xb   :  { %p75_p6 = por %p74_p5, %p73_p4 }
   0xd   :  { %p76_p7 = pnand %p75_p6, %p69_p3 }
   0xf   :  { %79 = shalt.err (!%p76_p7)
}
  0x10   :  { %s107_s16 = smov 128   ;;  %s108_s17 = smov 8  }
  0x11   :  { %19 = dma.hbm_to_vmem [thread:$0]  %s150_s0, 256, %s14_s7, [#allocation3], %s107_s16, %s107_s16, %s108_s17  }
  0x12   :  { %102 = dma.done.wait [#allocation3], 256  }
  0x13   :  { %103 = vsyncadd [#allocation3], 4294967040  ;;  %v23_v0 = vld [vmem:[#allocation2] sm:$0xff]  ;;  %v24_v1 = vld [vmem:[#allocation2 + $0x8] sm:$0xff]  ;;  %s109_s20 = smov [#allocation5]  }
  0x14   :  { %v25_v2 = vmax.f32 %v23_v0, 1e-06  ;;  %v26_v3 = vmax.f32 %v24_v1, 1e-06  ;;  %s38_s21 = sshll.u32 %s109_s20, 4  ;;  %s39_s21 = int_to_ptr.vmem [resolvable:$true] %s38_s21 }
  0x15   :  { %s80_s22 = scalar_lea.vmem %s39_s21, 256  ;;  %p85_p9 = scmp.lt.s32.totalorder %s39_s21, %s39_s21 }
  0x16   :  { %54 = vlog2.f32 %v25_v2  ;;  %p81_p8 = scmp.ne.s32.totalorder %s39_s21, %s80_s22  ;;  %p86_p10 = scmp.lt.s32.totalorder %s80_s22, %s80_s22 }
  0x17   :  { %56 = vlog2.f32 %v26_v3 }
  0x18   :  { %p87_p11 = por %p86_p10, %p85_p9 }
  0x1a   :  { %p88_p12 = pnand %p87_p11, %p81_p8 }
  0x20   :  { %v55_v4 = vpop.eup %54 }
  0x21   :  { %v57_v5 = vpop.eup %56  ;;  %v28_v6 = vmul.f32 0.6931472, %v55_v4 }
  0x22   :  { %v30_v7 = vmul.f32 0.6931472, %v57_v5 }
  0x23   :  { %31 = vst [vmem:[#allocation5] sm:$0xff] %v28_v6 }
  0x24   :  { %32 = vst [vmem:[#allocation5 + $0x8] sm:$0xff] %v30_v7 }
  0x25   :  { %91 = shalt.err (!%p88_p12)
}
  0x26   :  { %s92_s24 = scalar_lea.hbm %s151_s1, 256 }
  0x27   :  { %p93_p13 = scmp.ne.s32.totalorder %s151_s1, %s92_s24  ;;  %p96_p0 = scmp.lt.u32.totalorder %s92_s24, %s151_s1 }
  0x29   :  { %p98_p1 = pnand %p96_p0, %p93_p13 }
  0x2b   :  { %101 = shalt.err (!%p98_p1)
}
  0x2c   :  { %44 = dma.vmem_to_hbm [thread:$0]  %s39_s21, 256, %s151_s1, [#allocation4], %s107_s16, %s107_s16, %s108_s17  }
  0x2d   :  { %104 = dma.done.wait [#allocation4], 256  }
  0x2e   :  { %105 = vsyncadd [#allocation4], 4294967040 }
  0x2f   :  { %48 = vsyncpa [#allocation3], 1 }
  0x30   :  { %49 = vsyncpa [#allocation4], 1 }

</bundles_post_ra>
